<compile_context>
chip_gen: v7x
topology: tpu7x:2x2x1
jax: 0.10.0
libtpu: 0.0.40
codegen_flags: <defaults>
</compile_context>

<pallas_src>
import jax
import jax.numpy as jnp
import numpy as np
from jax.experimental import pallas as pl
from jax.experimental.pallas import tpu as pltpu

BN_EPS = 1e-5


# ----------------------------- Pallas kernels ------------------------------ #

def _pw_bn_relu_kernel(x_ref, w_ref, scale_ref, shift_ref, o_ref):
    # out = relu((x @ w) * scale + shift); bf16 inputs, f32 accumulate + epilogue.
    acc = jnp.dot(x_ref[...], w_ref[...], preferred_element_type=jnp.float32)
    y = acc * scale_ref[...] + shift_ref[...]
    o_ref[...] = jnp.maximum(y, 0.0).astype(o_ref.dtype)


def _conv2_conv3_kernel(x0_ref, x1_ref, x2_ref, w2_ref, s2_ref, b2_ref,
                        w3_ref, s3_ref, b3_ref, res_ref, o_ref):
    # Per grid step: one (n, d) output plane.
    #   x{kd}_ref : (L, cin)  flattened padded plane at padded depth d+kd, L = Hp*Wp+2
    #   w2_ref    : (27, cin, cin)   resident tap weights
    #   w3_ref    : (cin, cout)      resident 1x1x1 weight
    #   res_ref   : (H, W, cout) f32 residual, o_ref : (H, W, cout) f32 output
    H, W, cout = o_ref.shape
    Wp = W + 2
    cin = w3_ref.shape[0]
    nrows = H * Wp  # rows computed per plane; 2 junk columns per row are discarded below

    xrefs = (x0_ref, x1_ref, x2_ref)
    acc = jnp.zeros((nrows, cin), jnp.float32)
    # 27 taps of the 3x3x3 conv: each tap is a static row-offset slice of the flattened
    # padded plane -> one MXU dot; all reduced in-register (f32).
    for kd in range(3):
        for kh in range(3):
            for kw in range(3):
                start = kh * Wp + kw
                lhs = xrefs[kd][start:start + nrows, :]
                acc = acc + jnp.dot(lhs, w2_ref[kd * 9 + kh * 3 + kw],
                                    preferred_element_type=jnp.float32)

    # bn2 + relu (f32 epilogue)
    y = jnp.maximum(acc * s2_ref[...] + b2_ref[...], 0.0)

    # conv3 (1x1x1) + bn3, still per-row independent so junk columns stay isolated
    z = jnp.dot(y.astype(jnp.bfloat16), w3_ref[...],
                preferred_element_type=jnp.float32)
    z = z * s3_ref[...] + b3_ref[...]

    # residual add + relu + store, discarding the 2 padded-width columns per row
    for h in range(H):
        row = z[h * Wp:h * Wp + W, :] + res_ref[h]
        o_ref[h] = jnp.maximum(row, 0.0).astype(o_ref.dtype)


# ------------------------------ Pallas wrappers ----------------------------- #

def pointwise_conv_bn_relu(x2d, w_mat, scale, shift, tm_max=512):
    """relu(bn(x @ w)) over an (M, cin) channels-last activation; returns (M, cout) bf16."""
    M, cin = x2d.shape
    cout = w_mat.shape[1]
    tm = max(min(tm_max, M), 1)
    Mp = pl.cdiv(M, tm) * tm
    if Mp != M:
        x2d = jnp.pad(x2d, ((0, Mp - M), (0, 0)))
    out = pl.pallas_call(
        _pw_bn_relu_kernel,
        out_shape=jax.ShapeDtypeStruct((Mp, cout), jnp.bfloat16),
        grid_spec=pltpu.PrefetchScalarGridSpec(
            num_scalar_prefetch=0,
            grid=(Mp // tm,),
            in_specs=[pl.BlockSpec((tm, cin), lambda i: (i, 0)),
                      pl.BlockSpec((cin, cout), lambda i: (0, 0)),
                      pl.BlockSpec((1, cout), lambda i: (0, 0)),
                      pl.BlockSpec((1, cout), lambda i: (0, 0))],
            out_specs=pl.BlockSpec((tm, cout), lambda i: (i, 0))),
        compiler_params=pltpu.CompilerParams(dimension_semantics=("parallel",)),
    )(x2d, w_mat, scale, shift)
    return out[:M] if Mp != M else out


def conv2_bn_relu_conv3_bn_add_relu(xflat, w2taps, scale2, shift2,
                                    w3_mat, scale3, shift3, res, *, H, W):
    """Fused conv2(3x3x3,pad1) + bn2 + relu + conv3(1x1x1) + bn3 + residual + relu."""
    N, Dp, L, cin = xflat.shape
    D = Dp - 2
    cout = w3_mat.shape[1]

    def xspec(kd):
        # Same flattened padded tensor, viewed at padded depth d + kd (overlapping halo).
        return pl.BlockSpec((None, None, L, cin),
                            lambda n, d, kd=kd: (n, d + kd, 0, 0))

    return pl.pallas_call(
        _conv2_conv3_kernel,
        out_shape=jax.ShapeDtypeStruct((N, D, H, W, cout), jnp.float32),
        grid_spec=pltpu.PrefetchScalarGridSpec(
            num_scalar_prefetch=0,
            grid=(N, D),
            in_specs=[xspec(0), xspec(1), xspec(2),
                      pl.BlockSpec((27, cin, cin), lambda n, d: (0, 0, 0)),
                      pl.BlockSpec((1, cin), lambda n, d: (0, 0)),
                      pl.BlockSpec((1, cin), lambda n, d: (0, 0)),
                      pl.BlockSpec((cin, cout), lambda n, d: (0, 0)),
                      pl.BlockSpec((1, cout), lambda n, d: (0, 0)),
                      pl.BlockSpec((1, cout), lambda n, d: (0, 0)),
                      pl.BlockSpec((None, None, H, W, cout),
                                   lambda n, d: (n, d, 0, 0, 0))],
            out_specs=pl.BlockSpec((None, None, H, W, cout),
                                   lambda n, d: (n, d, 0, 0, 0))),
        compiler_params=pltpu.CompilerParams(
            dimension_semantics=("parallel", "parallel")),
    )(xflat, xflat, xflat, w2taps, scale2, shift2, w3_mat, scale3, shift3, res)


# ------------------------------- Bottleneck --------------------------------- #

def _fold_bn(gamma, beta, mean, var, eps=BN_EPS):
    scale = gamma / jnp.sqrt(var + eps)
    shift = beta - mean * scale
    return (scale.reshape(1, -1).astype(jnp.float32),
            shift.reshape(1, -1).astype(jnp.float32))


def bottleneck_forward(x_ncdhw, params):
    """Pallas implementation of Bottleneck.forward (stride=1, downsample=None)."""
    N, cin, D, H, W = x_ncdhw.shape
    w1, w2, w3 = params["w1"], params["w2"], params["w3"]
    planes = w1.shape[0]
    out_c = w3.shape[0]
    assert out_c == cin, "downsample=None requires inplanes == 4*planes"

    x_ndhwc = jnp.transpose(x_ncdhw, (0, 2, 3, 4, 1)).astype(jnp.float32)  # NCDHW -> NDHWC
    M = N * D * H * W

    scale1, shift1 = _fold_bn(*params["bn1"])
    scale2, shift2 = _fold_bn(*params["bn2"])
    scale3, shift3 = _fold_bn(*params["bn3"])

    # --- conv1 (1x1x1) + bn1 + relu ---  (bf16 MXU feeds, f32 accumulate)
    x2d = x_ndhwc.reshape(M, cin).astype(jnp.bfloat16)
    w1_mat = jnp.transpose(w1.reshape(planes, cin)).astype(jnp.bfloat16)   # (cin, planes)
    o1 = pointwise_conv_bn_relu(x2d, w1_mat, scale1, shift1)               # (M, planes) bf16

    # --- fused conv2 + bn2 + relu + conv3 + bn3 + residual + relu ---
    o1_5d = o1.reshape(N, D, H, W, planes)
    xp = jnp.pad(o1_5d, ((0, 0), (1, 1), (1, 1), (1, 1), (0, 0)))          # halo pad
    Dp, Hp, Wp = D + 2, H + 2, W + 2
    # Flatten each padded (Hp, Wp) plane to 2-D rows + 2 trailing zero rows so every tap
    # is a static contiguous row-slice inside the kernel (no im2col materialization).
    xflat = jnp.pad(xp.reshape(N, Dp, Hp * Wp, planes), ((0, 0), (0, 0), (0, 2), (0, 0)))
    w2taps = jnp.transpose(w2, (2, 3, 4, 1, 0)).reshape(27, planes, planes).astype(jnp.bfloat16)
    w3_mat = jnp.transpose(w3.reshape(out_c, planes)).astype(jnp.bfloat16)  # (planes, out_c)

    out_ndhwc = conv2_bn_relu_conv3_bn_add_relu(
        xflat, w2taps, scale2, shift2, w3_mat, scale3, shift3, x_ndhwc, H=H, W=W)

    return jnp.transpose(out_ndhwc, (0, 4, 1, 2, 3))                       # back to NCDHW


# -------------------------- plain-JAX reference ------------------------------ #

def reference_forward(x, params):
    def bn(z, gamma, beta, mean, var, eps=BN_EPS):
        s = (1, -1, 1, 1, 1)
        return (z - mean.reshape(s)) / jnp.sqrt(var.reshape(s) + eps) * gamma.reshape(s) + beta.reshape(s)

    dn = ("NCDHW", "OIDHW", "NCDHW")
    out = jax.lax.conv_general_dilated(x, params["w1"], (1, 1, 1), "VALID", dimension_numbers=dn)
    out = jax.nn.relu(bn(out, *params["bn1"]))
    out = jax.lax.conv_general_dilated(out, params["w2"], (1, 1, 1), [(1, 1)] * 3, dimension_numbers=dn)
    out = jax.nn.relu(bn(out, *params["bn2"]))
    out = jax.lax.conv_general_dilated(out, params["w3"], (1, 1, 1), "VALID", dimension_numbers=dn)
    out = bn(out, *params["bn3"])
    return jax.nn.relu(out + x)


# ------------------------------------ main ----------------------------------- #

if __name__ == "__main__":
    key = jax.random.PRNGKey(0)
    ks = jax.random.split(key, 8)

    N, planes = 2, 8
    inplanes = 4 * planes          # required for the identity-residual path
    D = H = W = 4

    x = jax.random.normal(ks[0], (N, inplanes, D, H, W), jnp.float32)
    w1 = 0.1 * jax.random.normal(ks[1], (planes, inplanes, 1, 1, 1), jnp.float32)
    w2 = 0.1 * jax.random.normal(ks[2], (planes, planes, 3, 3, 3), jnp.float32)
    w3 = 0.1 * jax.random.normal(ks[3], (4 * planes, planes, 1, 1, 1), jnp.float32)

    def bn_init(k, c):
        k1, k2, k3, k4 = jax.random.split(k, 4)
        gamma = 1.0 + 0.1 * jax.random.normal(k1, (c,), jnp.float32)
        beta = 0.1 * jax.random.normal(k2, (c,), jnp.float32)
        mean = 0.1 * jax.random.normal(k3, (c,), jnp.float32)
        var = 1.0 + 0.1 * jax.random.uniform(k4, (c,), jnp.float32)
        return gamma, beta, mean, var

    params = {
        "w1": w1, "w2": w2, "w3": w3,
        "bn1": bn_init(ks[4], planes),
        "bn2": bn_init(ks[5], planes),
        "bn3": bn_init(ks[6], 4 * planes),
    }

    out = bottleneck_forward(x, params)
    out = jax.block_until_ready(out)

    ref = reference_forward(x, params)
    ref = jax.block_until_ready(ref)

    assert out.shape == ref.shape == (N, 4 * planes, D, H, W)
    # bf16 MXU feeds with f32 accumulation: ~2e-3 typical error; 2e-2 tolerance is safe
    # while still catching any real indexing/weight-layout bug (which would be O(0.1-1)).
    if not np.allclose(np.asarray(out), np.asarray(ref), atol=2e-2, rtol=2e-2):
        raise AssertionError("Pallas Bottleneck output does not match reference")

    print("KERNEL_OK")
</pallas_src>

<mosaic_0001>
module attributes {stable_mosaic.version = 11 : i64} {
  func.func @_pw_bn_relu_kernel(%arg0: i32, %arg1: memref<128x32xbf16, #tpu.memory_space<vmem>>, %arg2: memref<32x8xbf16, #tpu.memory_space<vmem>>, %arg3: memref<1x8xf32, #tpu.memory_space<vmem>>, %arg4: memref<1x8xf32, #tpu.memory_space<vmem>>, %arg5: memref<128x8xbf16, #tpu.memory_space<vmem>>) attributes {dimension_semantics = [#tpu.dimension_semantics<parallel>], iteration_bounds = array<i64: 1>, scalar_prefetch = 0 : i64, scratch_operands = 0 : i64, tpu.core_type = #tpu.core_type<tc>, window_params = [{transform_indices = @transform_0, window_bounds = array<i64: 128, 32>}, {pipeline_mode = #tpu.pipeline_mode<synchronous>, transform_indices = @transform_1, window_bounds = array<i64: 32, 8>}, {pipeline_mode = #tpu.pipeline_mode<synchronous>, transform_indices = @transform_2, window_bounds = array<i64: 1, 8>}, {pipeline_mode = #tpu.pipeline_mode<synchronous>, transform_indices = @transform_3, window_bounds = array<i64: 1, 8>}, {transform_indices = @transform_4, window_bounds = array<i64: 128, 8>}]} {
    %c0 = arith.constant 0 : index
    %c0_0 = arith.constant 0 : index
    %0 = vector.load %arg1[%c0, %c0_0] : memref<128x32xbf16, #tpu.memory_space<vmem>>, vector<128x32xbf16>
    %c0_1 = arith.constant 0 : index
    %c0_2 = arith.constant 0 : index
    %1 = vector.load %arg2[%c0_1, %c0_2] : memref<32x8xbf16, #tpu.memory_space<vmem>>, vector<32x8xbf16>
    %cst = arith.constant dense<0.000000e+00> : vector<128x8xf32>
    %2 = tpu.matmul %0, %1, %cst {dimension_numbers = #tpu.dot_dimension_numbers<[1], [0], [0], [1], [0, 0, 1, 1], [], []>} : vector<128x32xbf16>, vector<32x8xbf16>, vector<128x8xf32> -> vector<128x8xf32>
    %c0_3 = arith.constant 0 : index
    %c0_4 = arith.constant 0 : index
    %3 = vector.load %arg3[%c0_3, %c0_4] : memref<1x8xf32, #tpu.memory_space<vmem>>, vector<1x8xf32>
    %4 = vector.broadcast %3 : vector<1x8xf32> to vector<128x8xf32>
    %5 = arith.mulf %2, %4 : vector<128x8xf32>
    %c0_5 = arith.constant 0 : index
    %c0_6 = arith.constant 0 : index
    %6 = vector.load %arg4[%c0_5, %c0_6] : memref<1x8xf32, #tpu.memory_space<vmem>>, vector<1x8xf32>
    %7 = vector.broadcast %6 : vector<1x8xf32> to vector<128x8xf32>
    %8 = arith.addf %5, %7 : vector<128x8xf32>
    %cst_7 = arith.constant 0.000000e+00 : f32
    %9 = vector.broadcast %cst_7 : f32 to vector<128x8xf32>
    %10 = arith.maximumf %8, %9 : vector<128x8xf32>
    %11 = arith.truncf %10 : vector<128x8xf32> to vector<128x8xbf16>
    %c0_8 = arith.constant 0 : index
    %c0_9 = arith.constant 0 : index
    %12 = vector.load %arg5[%c0_8, %c0_9] : memref<128x8xbf16, #tpu.memory_space<vmem>>, vector<128x8xbf16>
    tpu.vector_store %arg5[%c0_8, %c0_9], %11 {strides = array<i32>} : memref<128x8xbf16, #tpu.memory_space<vmem>>, vector<128x8xbf16>,
    return
  }
  func.func @transform_0(%arg0: i32) -> (i32, i32) {
    %c0_i32 = arith.constant 0 : i32
    %c0_i32_0 = arith.constant 0 : i32
    return %arg0, %c0_i32 : i32, i32
  }
  func.func @transform_1(%arg0: i32) -> (i32, i32) {
    %c0_i32 = arith.constant 0 : i32
    %c0_i32_0 = arith.constant 0 : i32
    %c0_i32_1 = arith.constant 0 : i32
    return %c0_i32, %c0_i32_0 : i32, i32
  }
  func.func @transform_2(%arg0: i32) -> (i32, i32) {
    %c0_i32 = arith.constant 0 : i32
    %c0_i32_0 = arith.constant 0 : i32
    %c0_i32_1 = arith.constant 0 : i32
    return %c0_i32, %c0_i32_0 : i32, i32
  }
  func.func @transform_3(%arg0: i32) -> (i32, i32) {
    %c0_i32 = arith.constant 0 : i32
    %c0_i32_0 = arith.constant 0 : i32
    %c0_i32_1 = arith.constant 0 : i32
    return %c0_i32, %c0_i32_0 : i32, i32
  }
  func.func @transform_4(%arg0: i32) -> (i32, i32) {
    %c0_i32 = arith.constant 0 : i32
    %c0_i32_0 = arith.constant 0 : i32
    return %arg0, %c0_i32 : i32, i32
  }
}

</mosaic_0001>

<bundles_post_ra>
// kernel: tpu_custom_call.1
= control target key start
LH: loop header
LB: loop body
LE: loop exit
PB: predicated region body
PF: predicated region fallthrough
CT: control target
= control target key end

     0   :  { %vm90_vm0 = vcmask 261120   ;;  %vm338_vm1 = vcmask 60416   ;;  %s624_s1 = inlined_call_operand.vmem [shape: bf16[32,8], index: 1, kind: input, shape index: {}]   ;;  %s625_s0 = inlined_call_operand.vmem [shape: bf16[128,32], index: 0, kind: input, shape index: {}]   ;;  %s626_s2 = inlined_call_operand.vmem [shape: f32[1,8], index: 2, kind: input, shape index: {}]   ;;  %s627_s3 = inlined_call_operand.vmem [shape: f32[1,8], index: 3, kind: input, shape index: {}]   ;;  %s628_s4 = inlined_call_operand.vmem [shape: bf16[128,8], index: 4, kind: output, shape index: {}]  }
   0x1   :  { %v445_v0 = vld [vmem:[%s624_s1] sm:$0xff]   ;;  %v446_v1 = vld [vmem:[%s624_s1 + $0x8] sm:$0xff]   ;;  %v451_v6 = vld [vmem:[%s625_s0 + $0x10] sm:$0xff]  }
   0x2   :  { %421 = vmatprep.subr.bf16.mxu0 %v445_v0  ;;  %441 = vmatprep.subr.bf16.mxu1 %v445_v0  ;;  %v447_v2 = vld [vmem:[%s625_s0] sm:$0xff]   ;;  %v449_v4 = vld [vmem:[%s625_s0 + $0x8] sm:$0xff]   ;;  %v452_v7 = vld [vmem:[%s625_s0 + $0x30] sm:$0xff]  }
   0x3   :  { %422 = vmatpush3.bf16.msra.mxu0 %v445_v0  ;;  %443 = vmatpush3.bf16.msra.mxu1 %v445_v0  ;;  %v448_v3 = vld [vmem:[%s625_s0 + $0x20] sm:$0xff]   ;;  %v450_v5 = vld [vmem:[%s625_s0 + $0x28] sm:$0xff]   ;;  %v453_v8 = vld [vmem:[%s625_s0 + $0x18] sm:$0xff]  }
   0x4   :  { %423 = vmatprep.subr.bf16.mxu0 %v446_v1  ;;  %442 = vmatprep.subr.bf16.mxu1 %v446_v1  ;;  %v454_v9 = vld [vmem:[%s625_s0 + $0x38] sm:$0xff]   ;;  %v521_v10 = vld [vmem:[%s626_s2] ss:$0 sm:$0xff] }
   0x5   :  { %425 = vmatprep.mubr.msk.bf16.mxu0 %vm90_vm0, %v447_v2  ;;  %433 = vmatprep.mubr.msk.bf16.mxu1 %vm90_vm0, %v448_v3  ;;  %v526_v12 = vld [vmem:[%s627_s3] ss:$0 sm:$0xff] }
   0x7   :  { %424 = vmatpush3.bf16.msra.mxu0 %v446_v1  ;;  %444 = vmatpush3.bf16.msra.mxu1 %v446_v1 }
   0xa   :  { %426 = vmatmul.mubr.msk.bf16.vlgmr.msra.gmra.mrb[0].mxu0 %vm90_vm0, %v449_v4  ;;  %434 = vmatmul.mubr.msk.bf16.vlgmr.msra.gmra.mrb[0].mxu1 %vm90_vm0, %v450_v5 }
   0xb   :  { %429 = vmatprep.mubr.msk.bf16.mxu0 %vm90_vm0, %v451_v6  ;;  %437 = vmatprep.mubr.msk.bf16.mxu1 %vm90_vm0, %v452_v7 }
  0x12   :  { %430 = vmatmul.mubr.msk.bf16.gmra.mrb[4].mxu0 %vm90_vm0, %v453_v8  ;;  %438 = vmatmul.mubr.msk.bf16.gmra.mrb[4].mxu1 %vm90_vm0, %v454_v9 }
  0xdd   :  { %v427_v11 = vpop.f32.mrb[0].mxu0  ;;  %v435_v13 = vpop.f32.mrb[0].mxu1 }
  0xde   :  { %v221_v14 = vmul.f32 %v427_v11, %v521_v10  ;;  %v229_v15 = vmul.f32 %v435_v13, %v521_v10  ;;  %v149_v16 = vpop.f32.mrb[1].mxu0  ;;  %v181_v17 = vpop.f32.mrb[1].mxu1 }
  0xdf   :  { %v219_v18 = vmul.f32 %v521_v10, %v149_v16  ;;  %v227_v19 = vmul.f32 %v521_v10, %v181_v17  ;;  %v428_v20 = vpop.f32.mrb[2].mxu0  ;;  %v436_v21 = vpop.f32.mrb[2].mxu1 }
  0xe0   :  { %v244_v22 = vadd.f32 %v526_v12, %v221_v14  ;;  %v252_v23 = vadd.f32 %v526_v12, %v229_v15  ;;  %v222_v24 = vmul.f32 %v428_v20, %v521_v10  ;;  %v230_v25 = vmul.f32 %v436_v21, %v521_v10  ;;  %v152_v26 = vpop.f32.mrb[3].mxu0  ;;  %v184_v27 = vpop.f32.mrb[3].mxu1 }
  0xe1   :  { %v242_v28 = vadd.f32 %v526_v12, %v219_v18  ;;  %v250_v29 = vadd.f32 %v526_v12, %v227_v19  ;;  %v220_v30 = vmul.f32 %v521_v10, %v152_v26  ;;  %v228_v31 = vmul.f32 %v521_v10, %v184_v27 }
  0xe2   :  { %v260_v32 = vmax.f32 %v244_v22, 0.0  ;;  %v268_v33 = vmax.f32 %v252_v23, 0.0  ;;  %v245_v34 = vadd.f32 %v526_v12, %v222_v24  ;;  %v253_v35 = vadd.f32 %v526_v12, %v230_v25 }
  0xe3   :  { %v258_v36 = vmax.f32 %v242_v28, 0.0  ;;  %v266_v37 = vmax.f32 %v250_v29, 0.0  ;;  %v243_v38 = vadd.f32 %v526_v12, %v220_v30  ;;  %v251_v39 = vadd.f32 %v526_v12, %v228_v31 }
  0xe4   :  { %v397_v40 = vpack.c.bf16 %v260_v32, %v260_v32  ;;  %v405_v41 = vpack.c.bf16 %v268_v33, %v268_v33  ;;  %v261_v42 = vmax.f32 %v245_v34, 0.0  ;;  %v269_v43 = vmax.f32 %v253_v35, 0.0 }
  0xe5   :  { %v395_v44 = vpack.c.bf16 %v258_v36, %v258_v36  ;;  %v403_v45 = vpack.c.bf16 %v266_v37, %v266_v37  ;;  %v259_v46 = vmax.f32 %v243_v38, 0.0  ;;  %v267_v47 = vmax.f32 %v251_v39, 0.0  ;;  %v431_v48 = vpop.f32.mrb[4].mxu0  ;;  %v439_v49 = vpop.f32.mrb[4].mxu1 }
  0xe6   :  { %341 = vst.msk [vmem:[%s628_s4 + $0x8] sm:$0xf] %vm338_vm1, %v397_v40  ;;  %349 = vst.msk [vmem:[%s628_s4 + $0x28] sm:$0xf] %vm338_vm1, %v405_v41  ;;  %v398_v50 = vpack.c.bf16 %v261_v42, %v261_v42  ;;  %v406_v51 = vpack.c.bf16 %v269_v43, %v269_v43  ;;  %v225_v52 = vmul.f32 %v431_v48, %v521_v10  ;;  %v165_v54 = vpop.f32.mrb[5].mxu0  ;;  %v197_v55 = vpop.f32.mrb[5].mxu1 }
  0xe7   :  { %v233_v53 = vmul.f32 %v439_v49, %v521_v10  ;;  %339 = vst.msk [vmem:[%s628_s4] sm:$0xf] %vm338_vm1, %v395_v44  ;;  %347 = vst.msk [vmem:[%s628_s4 + $0x20] sm:$0xf] %vm338_vm1, %v403_v45  ;;  %v396_v56 = vpack.c.bf16 %v259_v46, %v259_v46  ;;  %v404_v57 = vpack.c.bf16 %v267_v47, %v267_v47  ;;  %v432_v60 = vpop.f32.mrb[6].mxu0  ;;  %v440_v61 = vpop.f32.mrb[6].mxu1 }
  0xe8   :  { %v223_v58 = vmul.f32 %v521_v10, %v165_v54  ;;  %v231_v59 = vmul.f32 %v521_v10, %v197_v55  ;;  %342 = vst.msk [vmem:[%s628_s4 + $0xc] sm:$0xf] %vm338_vm1, %v398_v50  ;;  %350 = vst.msk [vmem:[%s628_s4 + $0x2c] sm:$0xf] %vm338_vm1, %v406_v51  ;;  %v248_v62 = vadd.f32 %v526_v12, %v225_v52  ;;  %v168_v2 = vpop.f32.mrb[7].mxu0  ;;  %v200_v3 = vpop.f32.mrb[7].mxu1 }
  0xe9   :  { %v256_v63 = vadd.f32 %v526_v12, %v233_v53  ;;  %v226_v0 = vmul.f32 %v432_v60, %v521_v10  ;;  %v234_v1 = vmul.f32 %v440_v61, %v521_v10  ;;  %340 = vst.msk [vmem:[%s628_s4 + $0x4] sm:$0xf] %vm338_vm1, %v396_v56  ;;  %348 = vst.msk [vmem:[%s628_s4 + $0x24] sm:$0xf] %vm338_vm1, %v404_v57 }
  0xea   :  { %v246_v4 = vadd.f32 %v526_v12, %v223_v58  ;;  %v254_v5 = vadd.f32 %v526_v12, %v231_v59  ;;  %v224_v6 = vmul.f32 %v521_v10, %v168_v2  ;;  %v232_v7 = vmul.f32 %v521_v10, %v200_v3 }
  0xeb   :  { %v264_v8 = vmax.f32 %v248_v62, 0.0  ;;  %v272_v9 = vmax.f32 %v256_v63, 0.0  ;;  %v249_v11 = vadd.f32 %v526_v12, %v226_v0  ;;  %v257_v13 = vadd.f32 %v526_v12, %v234_v1 }
  0xec   :  { %v262_v14 = vmax.f32 %v246_v4, 0.0  ;;  %v270_v15 = vmax.f32 %v254_v5, 0.0  ;;  %v247_v16 = vadd.f32 %v526_v12, %v224_v6  ;;  %v255_v17 = vadd.f32 %v526_v12, %v232_v7 }
  0xed   :  { %v401_v18 = vpack.c.bf16 %v264_v8, %v264_v8  ;;  %v409_v19 = vpack.c.bf16 %v272_v9, %v272_v9  ;;  %v265_v20 = vmax.f32 %v249_v11, 0.0  ;;  %v273_v21 = vmax.f32 %v257_v13, 0.0 }
  0xee   :  { %v399_v22 = vpack.c.bf16 %v262_v14, %v262_v14  ;;  %v407_v23 = vpack.c.bf16 %v270_v15, %v270_v15  ;;  %v263_v24 = vmax.f32 %v247_v16, 0.0  ;;  %v271_v10 = vmax.f32 %v255_v17, 0.0 }
  0xef   :  { %345 = vst.msk [vmem:[%s628_s4 + $0x18] sm:$0xf] %vm338_vm1, %v401_v18  ;;  %353 = vst.msk [vmem:[%s628_s4 + $0x38] sm:$0xf] %vm338_vm1, %v409_v19  ;;  %v402_v25 = vpack.c.bf16 %v265_v20, %v265_v20  ;;  %v410_v12 = vpack.c.bf16 %v273_v21, %v273_v21 }
  0xf0   :  { %343 = vst.msk [vmem:[%s628_s4 + $0x10] sm:$0xf] %vm338_vm1, %v399_v22  ;;  %351 = vst.msk [vmem:[%s628_s4 + $0x30] sm:$0xf] %vm338_vm1, %v407_v23  ;;  %v400_v26 = vpack.c.bf16 %v263_v24, %v263_v24  ;;  %v408_v27 = vpack.c.bf16 %v271_v10, %v271_v10 }
  0xf1   :  { %346 = vst.msk [vmem:[%s628_s4 + $0x1c] sm:$0xf] %vm338_vm1, %v402_v25  ;;  %354 = vst.msk [vmem:[%s628_s4 + $0x3c] sm:$0xf] %vm338_vm1, %v410_v12 }
  0xf2   :  { %344 = vst.msk [vmem:[%s628_s4 + $0x14] sm:$0xf] %vm338_vm1, %v400_v26  ;;  %352 = vst.msk [vmem:[%s628_s4 + $0x34] sm:$0xf] %vm338_vm1, %v408_v27 }

</bundles_post_ra>
